<compile_context>
chip_gen: v7x
topology: tpu7x:2x2x1
jax: 0.10.0
libtpu: 0.0.40
codegen_flags: <defaults>
</compile_context>

<pallas_src>
import functools

import jax
import jax.numpy as jnp
from jax import lax
from jax.experimental import pallas as pl
from jax.experimental.pallas import tpu as pltpu

_LANE = 128
_SUBLANE = 8
_BETA = 1.0          # nn.SmoothL1Loss default beta
_CHUNK_ROWS = 512    # in-kernel slab size (256 KiB f32 intermediates)


def _cdiv(a, b):
    return -(-a // b)


def _round_up(x, m):
    return ((x + m - 1) // m) * m


def _default_num_parallel():
    """2 where a chip exposes 2 TensorCores to one program (v7x, v4 megacore)."""
    try:
        kind = jax.devices()[0].device_kind.lower()
    except Exception:
        return 1
    return 2 if ("v7" in kind or "v4" in kind) else 1


def _make_kernel(tpc, tr, rows_valid, need_row_mask):
    """Kernel factory; all tiling config is static (baked via closure)."""
    n_chunks, rem_rows = divmod(tr, _CHUNK_ROWS)

    def accumulate(pred, gt, base_row, acc_sum, acc_cnt):
        pred = pred.astype(jnp.float32)
        gt = gt.astype(jnp.float32)
        mask = gt > 0.0                      # single compare, reused twice
        if need_row_mask:
            # Rows past the valid extent of the (rows, 128) array are garbage
            # (partial trailing block / clamped block) -> mask them out.
            ridx = lax.broadcasted_iota(jnp.int32, pred.shape, 0) + base_row
            mask = jnp.logical_and(mask, ridx < rows_valid)
        diff = pred - gt
        adiff = jnp.abs(diff)
        t = jnp.minimum(adiff, _BETA)
        # 2 * SmoothL1(beta=1) = t*t + 2*(|d| - t); the 0.5 and the module's
        # 2**(1-2) factor are folded into the host-side epilogue (one fewer
        # multiply per element in the kernel).
        elem = jnp.where(mask, t * t + (adiff - t) * 2.0, 0.0)
        cnt = jnp.where(mask, 1.0, 0.0)

        r = pred.shape[0]
        nf = (r // _SUBLANE) * _SUBLANE
        if nf:   # vreg-shaped accumulation: pure VPU adds into (8,128) scratch
            acc_sum[...] += jnp.sum(
                elem[:nf].reshape(nf // _SUBLANE, _SUBLANE, _LANE), axis=0)
            acc_cnt[...] += jnp.sum(
                cnt[:nf].reshape(nf // _SUBLANE, _SUBLANE, _LANE), axis=0)
        if r - nf:  # remainder rows (< 8), only for tiny inputs
            acc_sum[: r - nf, :] += elem[nf:, :]
            acc_cnt[: r - nf, :] += cnt[nf:, :]

    def kernel(pred_ref, gt_ref, out_ref, acc_sum, acc_cnt):
        j = pl.program_id(1)

        @pl.when(j == 0)
        def _():
            acc_sum[...] = jnp.zeros_like(acc_sum)
            acc_cnt[...] = jnp.zeros_like(acc_cnt)

        # Global row index of this tile's first row (unclamped on purpose so
        # duplicated/clamped blocks are fully masked by the row mask).
        base = (pl.program_id(0) * tpc + j) * tr

        if n_chunks:
            unroll = True if n_chunks <= 8 else 8

            def body(c, carry):
                off = pl.multiple_of(c * _CHUNK_ROWS, _CHUNK_ROWS)
                accumulate(pred_ref[pl.ds(off, _CHUNK_ROWS), :],
                           gt_ref[pl.ds(off, _CHUNK_ROWS), :],
                           base + off, acc_sum, acc_cnt)
                return carry

            lax.fori_loop(0, n_chunks, body, 0, unroll=unroll)

        if rem_rows:
            off = n_chunks * _CHUNK_ROWS
            accumulate(pred_ref[pl.ds(off, rem_rows), :],
                       gt_ref[pl.ds(off, rem_rows), :],
                       base + off, acc_sum, acc_cnt)

        @pl.when(j == pl.num_programs(1) - 1)
        def _():
            # One cheap cross-sublane (XLU) reduce per core at the very end:
            # row 0 = per-lane sum of 2*smooth_l1, row 1 = per-lane count.
            out_ref[0:1, :] = jnp.sum(acc_sum[...], axis=0, keepdims=True)
            out_ref[1:2, :] = jnp.sum(acc_cnt[...], axis=0, keepdims=True)

    return kernel


@functools.partial(jax.jit, static_argnames=("tile_bytes", "num_parallel"))
def sl1_loss(depth_pred, depth_gt, tile_bytes=4 << 20, num_parallel=None):
    """Masked SmoothL1 mean loss * 2**(1-2); mask = depth_gt > 0."""
    # TODO(synk): explicit `mask=` argument of the PyTorch module is not
    # implemented; the default mask (depth_gt > 0) is computed in-kernel.
    assert depth_pred.shape == depth_gt.shape
    n = depth_pred.size
    pred_flat = depth_pred.reshape(-1)   # free reshape; cast to f32 in-kernel
    gt_flat = depth_gt.reshape(-1)

    # Pad only to the next lane multiple (128 elems). For typical depth maps
    # this is a no-op (zero HBM copies); padded gt == 0 -> masked out.
    pad = (-n) % _LANE
    if pad:
        # TODO(synk): this still costs one copy when n % 128 != 0.
        pred_flat = jnp.pad(pred_flat, (0, pad))
        gt_flat = jnp.pad(gt_flat, (0, pad))
    rows = (n + pad) // _LANE

    itemsize = max(jnp.dtype(depth_pred.dtype).itemsize,
                   jnp.dtype(depth_gt.dtype).itemsize)
    # ~4 MiB per input buffer: tr=8192 for f32, 16384 for bf16.
    tr_pref = max(_CHUNK_ROWS,
                  (int(tile_bytes) // (_LANE * itemsize)) // _SUBLANE * _SUBLANE)

    if num_parallel is None:
        num_parallel = _default_num_parallel()

    if rows <= tr_pref:
        # Small input: one block covering the whole array (any row count OK).
        P, tpc, tr = 1, 1, rows
    else:
        P = max(1, int(num_parallel))
        tpc = _cdiv(_cdiv(rows, P), tr_pref)          # tiles per core
        tr = _round_up(_cdiv(rows, P * tpc), _SUBLANE)

    tiles_total = P * tpc
    need_row_mask = (tiles_total * tr != rows)

    pred_2d = pred_flat.reshape(rows, _LANE)
    gt_2d = gt_flat.reshape(rows, _LANE)

    if (tiles_total - 1) * tr < rows:
        def in_index(p, j):
            return (p * tpc + j, 0)
    else:
        # Degenerate split: keep the DMA in bounds; duplicated data is fully
        # masked in-kernel via the global row index.
        max_blk = (rows - 1) // tr

        def in_index(p, j):
            return (jnp.minimum(p * tpc + j, max_blk), 0)

    kernel = _make_kernel(tpc, tr, rows, need_row_mask)

    in_bytes = rows * _LANE * (jnp.dtype(depth_pred.dtype).itemsize +
                               jnp.dtype(depth_gt.dtype).itemsize)
    cost = pl.CostEstimate(flops=10 * n, transcendentals=0,
                           bytes_accessed=in_bytes + P * 2 * _LANE * 4)

    # VMEM budget: 2 pipeline buffers x (pred + gt) tiles, plus chunked
    # intermediates / scratch / outputs headroom.  Fits v5e's default-exceeded
    # case explicitly and stays well inside v7x's 64 MiB physical VMEM.
    tile_in_bytes = tr * _LANE * (jnp.dtype(depth_pred.dtype).itemsize +
                                  jnp.dtype(depth_gt.dtype).itemsize)
    vmem_limit = int(min(56 << 20, max(24 << 20, 2 * tile_in_bytes + (8 << 20))))

    out = pl.pallas_call(
        kernel,
        out_shape=jax.ShapeDtypeStruct((P, 2, _LANE), jnp.float32),
        grid_spec=pltpu.PrefetchScalarGridSpec(
            num_scalar_prefetch=0,
            grid=(P, tpc),
            in_specs=[
                pl.BlockSpec((tr, _LANE), in_index),
                pl.BlockSpec((tr, _LANE), in_index),
            ],
            out_specs=pl.BlockSpec((None, 2, _LANE), lambda p, j: (p, 0, 0)),
            scratch_shapes=[
                pltpu.VMEM((_SUBLANE, _LANE), jnp.float32),
                pltpu.VMEM((_SUBLANE, _LANE), jnp.float32),
            ],
        ),
        compiler_params=pltpu.CompilerParams(
            dimension_semantics=("parallel", "arbitrary"),
            vmem_limit_bytes=vmem_limit,
        ),
        cost_estimate=cost,
    )(pred_2d, gt_2d)

    totals = jnp.sum(out, axis=(0, 2))   # -> [sum of 2*smooth_l1, count]
    # loss = mean(smooth_l1 over mask) * 2**(1-2) = (totals[0]/2)/count * 0.5.
    # NOTE: count == 0 (no positive gt) yields NaN, matching PyTorch's mean
    # over an empty selection.  The f32 count accumulator is exact below
    # 2**24 masked elements per (sublane, lane) cell (~1.7e10 total elements
    # per core) -- far beyond any depth map.
    return totals[0] * 0.25 / totals[1]


def _reference(depth_pred, depth_gt):
    mask = depth_gt > 0
    diff = depth_pred.astype(jnp.float32) - depth_gt.astype(jnp.float32)
    adiff = jnp.abs(diff)
    elem = jnp.where(adiff < _BETA, 0.5 * diff * diff / _BETA, adiff - 0.5 * _BETA)
    elem = jnp.where(mask, elem, 0.0)
    return (jnp.sum(elem) / jnp.sum(mask.astype(jnp.float32))) * 0.5


if __name__ == "__main__":
    key = jax.random.PRNGKey(0)
    k1, k2 = jax.random.split(key)

    # Primary small test consistent with the module's forward (depth maps).
    B, H, W = 2, 16, 16
    depth_pred = jax.random.uniform(k1, (B, H, W), jnp.float32, 0.0, 5.0)
    depth_gt = jax.random.uniform(k2, (B, H, W), jnp.float32, -1.0, 5.0)
    depth_gt = jnp.where(depth_gt < 0.5, 0.0, depth_gt)  # non-trivial mask

    loss = jax.block_until_ready(sl1_loss(depth_pred, depth_gt))
    ref = _reference(depth_pred, depth_gt)
    assert jnp.allclose(loss, ref, rtol=1e-5, atol=1e-6), (loss, ref)

    # Ragged shape: exercises the lane-pad + sub-8-row remainder paths.
    k3, k4 = jax.random.split(k1)
    p2 = jax.random.uniform(k3, (3, 37, 41), jnp.float32, 0.0, 5.0)
    g2 = jax.random.uniform(k4, (3, 37, 41), jnp.float32, -1.0, 5.0)
    g2 = jnp.where(g2 < 0.5, 0.0, g2)
    l2 = jax.block_until_ready(sl1_loss(p2, g2))
    r2 = _reference(p2, g2)
    assert jnp.allclose(l2, r2, rtol=1e-5, atol=1e-6), (l2, r2)

    # Multi-tile path with a partial trailing block (forced via small tiles):
    # exercises the in-kernel row mask and the chunked fori_loop accumulation.
    k5, k6 = jax.random.split(k2)
    p3 = jax.random.uniform(k5, (1201, 128), jnp.float32, 0.0, 5.0)
    g3 = jax.random.uniform(k6, (1201, 128), jnp.float32, -1.0, 5.0)
    g3 = jnp.where(g3 < 0.5, 0.0, g3)
    l3 = jax.block_until_ready(sl1_loss(p3, g3, tile_bytes=1 << 18))
    r3 = _reference(p3, g3)
    assert jnp.allclose(l3, r3, rtol=1e-5, atol=1e-6), (l3, r3)

    print("KERNEL_OK")
</pallas_src>

<mosaic_0001>
module attributes {stable_mosaic.version = 11 : i64} {
  func.func @kernel(%arg0: i32, %arg1: i32, %arg2: memref<4x128xf32, #tpu.memory_space<vmem>>, %arg3: memref<4x128xf32, #tpu.memory_space<vmem>>, %arg4: memref<1x2x128xf32, #tpu.memory_space<vmem>>, %arg5: memref<8x128xf32, #tpu.memory_space<vmem>>, %arg6: memref<8x128xf32, #tpu.memory_space<vmem>>) attributes {dimension_semantics = [#tpu.dimension_semantics<parallel>, #tpu.dimension_semantics<arbitrary>], iteration_bounds = array<i64: 1, 1>, scalar_prefetch = 0 : i64, scratch_operands = 2 : i64, tpu.core_type = #tpu.core_type<tc>, window_params = [{transform_indices = @transform_0, window_bounds = array<i64: 4, 128>}, {transform_indices = @transform_1, window_bounds = array<i64: 4, 128>}, {transform_indices = @transform_2, window_bounds = array<i64: 1, 2, 128>}]} {
    %c0_i32 = arith.constant 0 : i32
    %0 = arith.cmpi eq, %arg1, %c0_i32 : i32
    %1 = arith.extui %0 : i1 to i32
    %c0_i32_0 = arith.constant 0 : i32
    %2 = arith.cmpi ne, %1, %c0_i32_0 : i32
    scf.if %2 {
      %cst_19 = arith.constant 0.000000e+00 : f32
      %30 = vector.broadcast %cst_19 : f32 to vector<8x128xf32>
      %c0_20 = arith.constant 0 : index
      %c0_21 = arith.constant 0 : index
      %31 = vector.load %arg5[%c0_20, %c0_21] : memref<8x128xf32, #tpu.memory_space<vmem>>, vector<8x128xf32>
      tpu.vector_store %arg5[%c0_20, %c0_21], %30 {strides = array<i32>} : memref<8x128xf32, #tpu.memory_space<vmem>>, vector<8x128xf32>,
      %cst_22 = arith.constant 0.000000e+00 : f32
      %32 = vector.broadcast %cst_22 : f32 to vector<8x128xf32>
      %c0_23 = arith.constant 0 : index
      %c0_24 = arith.constant 0 : index
      %33 = vector.load %arg6[%c0_23, %c0_24] : memref<8x128xf32, #tpu.memory_space<vmem>>, vector<8x128xf32>
      tpu.vector_store %arg6[%c0_23, %c0_24], %32 {strides = array<i32>} : memref<8x128xf32, #tpu.memory_space<vmem>>, vector<8x128xf32>,
    } else {
    }
    %c0 = arith.constant 0 : index
    %c0_1 = arith.constant 0 : index
    %3 = vector.load %arg2[%c0, %c0_1] : memref<4x128xf32, #tpu.memory_space<vmem>>, vector<4x128xf32>
    %c0_2 = arith.constant 0 : index
    %c0_3 = arith.constant 0 : index
    %4 = vector.load %arg3[%c0_2, %c0_3] : memref<4x128xf32, #tpu.memory_space<vmem>>, vector<4x128xf32>
    %cst = arith.constant 0.000000e+00 : f32
    %5 = vector.broadcast %cst : f32 to vector<4x128xf32>
    %6 = arith.cmpf ogt, %4, %5 : vector<4x128xf32>
    %7 = arith.subf %3, %4 : vector<4x128xf32>
    %8 = math.absf %7 : vector<4x128xf32>
    %cst_4 = arith.constant 1.000000e+00 : f32
    %9 = vector.broadcast %cst_4 : f32 to vector<4x128xf32>
    %10 = arith.minimumf %8, %9 : vector<4x128xf32>
    %11 = arith.mulf %10, %10 : vector<4x128xf32>
    %12 = arith.subf %8, %10 : vector<4x128xf32>
    %cst_5 = arith.constant 2.000000e+00 : f32
    %13 = vector.broadcast %cst_5 : f32 to vector<4x128xf32>
    %14 = arith.mulf %12, %13 : vector<4x128xf32>
    %15 = arith.addf %11, %14 : vector<4x128xf32>
    %cst_6 = arith.constant 0.000000e+00 : f32
    %16 = vector.broadcast %cst_6 : f32 to vector<4x128xf32>
    %17 = arith.select %6, %15, %16 : vector<4x128xi1>, vector<4x128xf32>
    %cst_7 = arith.constant 1.000000e+00 : f32
    %cst_8 = arith.constant 0.000000e+00 : f32
    %18 = vector.broadcast %cst_7 : f32 to vector<4x128xf32>
    %19 = vector.broadcast %cst_8 : f32 to vector<4x128xf32>
    %20 = arith.select %6, %18, %19 : vector<4x128xi1>, vector<4x128xf32>
    %c0_9 = arith.constant 0 : index
    %c0_10 = arith.constant 0 : index
    %21 = vector.load %arg5[%c0_9, %c0_10] : memref<8x128xf32, #tpu.memory_space<vmem>>, vector<4x128xf32>
    %22 = arith.addf %21, %17 : vector<4x128xf32>
    %c0_11 = arith.constant 0 : index
    %c0_12 = arith.constant 0 : index
    %23 = vector.load %arg5[%c0_11, %c0_12] : memref<8x128xf32, #tpu.memory_space<vmem>>, vector<4x128xf32>
    tpu.vector_store %arg5[%c0_11, %c0_12], %22 {strides = array<i32>} : memref<8x128xf32, #tpu.memory_space<vmem>>, vector<4x128xf32>,
    %c0_13 = arith.constant 0 : index
    %c0_14 = arith.constant 0 : index
    %24 = vector.load %arg6[%c0_13, %c0_14] : memref<8x128xf32, #tpu.memory_space<vmem>>, vector<4x128xf32>
    %25 = arith.addf %24, %20 : vector<4x128xf32>
    %c0_15 = arith.constant 0 : index
    %c0_16 = arith.constant 0 : index
    %26 = vector.load %arg6[%c0_15, %c0_16] : memref<8x128xf32, #tpu.memory_space<vmem>>, vector<4x128xf32>
    tpu.vector_store %arg6[%c0_15, %c0_16], %25 {strides = array<i32>} : memref<8x128xf32, #tpu.memory_space<vmem>>, vector<4x128xf32>,
    %c0_i32_17 = arith.constant 0 : i32
    %27 = arith.cmpi eq, %arg1, %c0_i32_17 : i32
    %28 = arith.extui %27 : i1 to i32
    %c0_i32_18 = arith.constant 0 : i32
    %29 = arith.cmpi ne, %28, %c0_i32_18 : i32
    scf.if %29 {
      %c0_19 = arith.constant 0 : index
      %c0_20 = arith.constant 0 : index
      %30 = vector.load %arg5[%c0_19, %c0_20] : memref<8x128xf32, #tpu.memory_space<vmem>>, vector<8x128xf32>
      %cst_21 = arith.constant dense<0.000000e+00> : vector<128xf32>
      %31 = vector.multi_reduction <add>, %30, %cst_21 [0] : vector<8x128xf32> to vector<128xf32>
      %32 = vector.shape_cast %31 : vector<128xf32> to vector<1x128xf32>
      %c0_22 = arith.constant 0 : index
      %c0_23 = arith.constant 0 : index
      %c0_24 = arith.constant 0 : index
      %33 = vector.load %arg4[%c0_22, %c0_23, %c0_24] : memref<1x2x128xf32, #tpu.memory_space<vmem>>, vector<1x1x128xf32>
      %34 = vector.shape_cast %33 : vector<1x1x128xf32> to vector<1x128xf32>
      %35 = vector.shape_cast %32 : vector<1x128xf32> to vector<1x1x128xf32>
      tpu.vector_store %arg4[%c0_22, %c0_23, %c0_24], %35 {strides = array<i32>} : memref<1x2x128xf32, #tpu.memory_space<vmem>>, vector<1x1x128xf32>,
      %c0_25 = arith.constant 0 : index
      %c0_26 = arith.constant 0 : index
      %36 = vector.load %arg6[%c0_25, %c0_26] : memref<8x128xf32, #tpu.memory_space<vmem>>, vector<8x128xf32>
      %cst_27 = arith.constant dense<0.000000e+00> : vector<128xf32>
      %37 = vector.multi_reduction <add>, %36, %cst_27 [0] : vector<8x128xf32> to vector<128xf32>
      %38 = vector.shape_cast %37 : vector<128xf32> to vector<1x128xf32>
      %c0_28 = arith.constant 0 : index
      %c1 = arith.constant 1 : index
      %c0_29 = arith.constant 0 : index
      %39 = vector.load %arg4[%c0_28, %c1, %c0_29] : memref<1x2x128xf32, #tpu.memory_space<vmem>>, vector<1x1x128xf32>
      %40 = vector.shape_cast %39 : vector<1x1x128xf32> to vector<1x128xf32>
      %41 = vector.shape_cast %38 : vector<1x128xf32> to vector<1x1x128xf32>
      tpu.vector_store %arg4[%c0_28, %c1, %c0_29], %41 {strides = array<i32>} : memref<1x2x128xf32, #tpu.memory_space<vmem>>, vector<1x1x128xf32>,
    } else {
    }
    return
  }
  func.func @transform_0(%arg0: i32, %arg1: i32) -> (i32, i32) {
    %c1_i32 = arith.constant 1 : i32
    %0 = arith.muli %arg0, %c1_i32 : i32
    %1 = arith.addi %0, %arg1 : i32
    %c0_i32 = arith.constant 0 : i32
    %c0_i32_0 = arith.constant 0 : i32
    return %1, %c0_i32 : i32, i32
  }
  func.func @transform_1(%arg0: i32, %arg1: i32) -> (i32, i32) {
    %c1_i32 = arith.constant 1 : i32
    %0 = arith.muli %arg0, %c1_i32 : i32
    %1 = arith.addi %0, %arg1 : i32
    %c0_i32 = arith.constant 0 : i32
    %c0_i32_0 = arith.constant 0 : i32
    return %1, %c0_i32 : i32, i32
  }
  func.func @transform_2(%arg0: i32, %arg1: i32) -> (i32, i32, i32) {
    %c0_i32 = arith.constant 0 : i32
    %c0_i32_0 = arith.constant 0 : i32
    %c0_i32_1 = arith.constant 0 : i32
    return %arg0, %c0_i32, %c0_i32_0 : i32, i32, i32
  }
}

</mosaic_0001>

<bundles_post_ra>
// kernel: sl1_loss.1
= control target key start
LH: loop header
LB: loop body
LE: loop exit
PB: predicated region body
PF: predicated region fallthrough
CT: control target
= control target key end

     0   :  { %v105_v0 = vmov 0.0   ;;  %s133_s0 = inlined_call_operand.vmem [shape: f32[4,128], index: 0, kind: input, shape index: {}]   ;;  %s134_s1 = inlined_call_operand.vmem [shape: f32[4,128], index: 1, kind: input, shape index: {}]   ;;  %s135_s2 = inlined_call_operand.vmem [shape: f32[1,2,128], index: 2, kind: output, shape index: {}]  }
   0x1   :  { %50 = vst [vmem:[#allocation3] sm:$0xff] %v105_v0  ;;  %49 = vst [vmem:[#allocation2] sm:$0xff] %v105_v0  ;;  %v51_v1 = vld [vmem:[%s133_s0] sm:$0xf] }
   0x2   :  { %v52_v2 = vld [vmem:[%s134_s1] sm:$0xf] }
   0x3   :  { %v54_v3 = vsub.f32 %v51_v1, %v52_v2  ;;  %vm53_vm0 = vcmp.gt.f32.partialorder %v52_v2, 0.0 }
   0x4   :  { %v62_v6 = vsel %vm53_vm0, 1.0, %v105_v0 }
   0x5   :  { %v55_v4 = vand.u32 2147483647, %v54_v3 }
   0x7   :  { %v56_v5 = vmin.f32 %v55_v4, 1.0 }
   0x8   :  { %v66_v7 = vld [vmem:[#allocation3] sm:$0xf]  ;;  %v63_v13 = vld [vmem:[#allocation2] sm:$0xf] }
   0x9   :  { %v57_v8 = vmul.f32 %v56_v5, %v56_v5  ;;  %v58_v9 = vsub.f32 %v55_v4, %v56_v5  ;;  %v67_v10 = vadd.f32 %v66_v7, %v62_v6 }
   0xb   :  { %v59_v11 = vmul.f32 2.0, %v58_v9  ;;  %68 = vst [vmem:[#allocation3] sm:$0xf] %v67_v10 }
   0xd   :  { %v60_v12 = vadd.f32 %v59_v11, %v57_v8 }
   0xf   :  { %v61_v14 = vsel %vm53_vm0, %v60_v12, 0.0 }
  0x10   :  { %v64_v15 = vadd.f32 %v63_v13, %v61_v14 }
  0x12   :  { %65 = vst [vmem:[#allocation2] sm:$0xf] %v64_v15  ;;  %v80_v16 = vld [vmem:[#allocation3] sm:$0xff] }
  0x13   :  { %v81_v17 = vrot.slane %v80_v16, 4 }
  0x15   :  { %v82_v18 = vadd.f32 %v81_v17, %v80_v16 }
  0x17   :  { %v83_v19 = vrot.slane %v82_v18, 2 }
  0x19   :  { %v72_v20 = vld [vmem:[#allocation2] sm:$0xff]  ;;  %v84_v21 = vadd.f32 %v83_v19, %v82_v18 }
  0x1a   :  { %v73_v22 = vrot.slane %v72_v20, 4 }
  0x1b   :  { %v85_v23 = vrot.slane %v84_v21, 1 }
  0x1c   :  { %v74_v24 = vadd.f32 %v73_v22, %v72_v20 }
  0x1d   :  { %v86_v25 = vadd.f32 %v85_v23, %v84_v21 }
  0x1e   :  { %v75_v26 = vrot.slane %v74_v24, 2 }
  0x1f   :  { %87 = vst [vmem:[%s135_s2 + $0x1] sm:$0x1] %v86_v25 }
  0x20   :  { %v76_v27 = vadd.f32 %v75_v26, %v74_v24 }
  0x22   :  { %v77_v28 = vrot.slane %v76_v27, 1 }
  0x24   :  { %v78_v29 = vadd.f32 %v77_v28, %v76_v27 }
  0x26   :  { %79 = vst [vmem:[%s135_s2] sm:$0x1] %v78_v29 }

</bundles_post_ra>
